<compile_context>
chip_gen: v7x
topology: tpu7x:2x2x1
jax: 0.10.0
libtpu: 0.0.40
codegen_flags: <defaults>
</compile_context>

<pallas_src>
import functools

import jax
import jax.numpy as jnp
from jax import lax
from jax.experimental import pallas as pl
from jax.experimental.pallas import tpu as pltpu


# ------------------------------ small helpers ------------------------------

def _round_up(x, m):
    return (x + m - 1) // m * m


def _pick_tn(n, cap=512):
    """Output-channel tile: full N if small, else largest 128-multiple divisor."""
    if n <= cap:
        return n
    for t in (cap, 256, 128):
        if n % t == 0:
            return t
    return 128  # n is always a multiple of 128 here


def _pick_tm(m, cap=512):
    """M (spatial) tile: full M if small, else largest 8-multiple divisor <= cap."""
    if m <= cap:
        return m
    t = cap - cap % 8
    while t >= 8:
        if m % t == 0:
            return t
        t -= 8
    return m


# ------------------------------ Pallas kernel -------------------------------

def _conv_kernel(*refs, tm, row_stride, c3, has_bias, num_m_tiles):
    """One (N-tile, image, M-tile) output block.

    a_ref  : (1, MA, 6*Cin)  space-to-depth'd padded image (MA = (Ho+1)*Wo)
    wa_ref : (6*Cin, tn)     weights for taps kh in {0, 1}
    wb_ref : (3*Cin, tn)     weights for tap  kh == 2
    b_ref  : (1, tn)         f32 bias (only if has_bias)
    o_ref  : (1, tm, tn)     output block
    """
    if has_bias:
        a_ref, wa_ref, wb_ref, b_ref, o_ref = refs
    else:
        a_ref, wa_ref, wb_ref, o_ref = refs
        b_ref = None

    if num_m_tiles == 1:
        r0 = 0                       # static slices
    else:
        r0 = pl.program_id(2) * tm
        if tm % 8 == 0:
            r0 = pl.multiple_of(r0, 8)   # sublane-aligned dynamic slice

    # term 0: taps kh in {0, 1}  (K = 6*Cin)
    acc = jnp.dot(a_ref[0, pl.ds(r0, tm), :], wa_ref[...],
                  preferred_element_type=jnp.float32)
    # term 1: tap kh == 2  (K = 3*Cin), rows shifted down by one output row
    acc = acc + jnp.dot(a_ref[0, pl.ds(r0 + row_stride, tm), :c3], wb_ref[...],
                        preferred_element_type=jnp.float32)
    if has_bias:
        acc = acc + b_ref[...]
    o_ref[0] = acc.astype(o_ref.dtype)


# ------------------------- conv (stride-2 3x3) wrapper -----------------------

def _build_act(x_nhwc, compute_dtype):
    """pad=1 + (row-pair, 3-col-window) space-to-depth, all in compute dtype.

    Returns A[b, rg*Wo + ow, p_h*3C + kw*C + c] = xpad[b, 2*rg + p_h, 2*ow + kw, c]
    with shape [B, (Ho+1)*Wo, 6*C].
    """
    B, H, W, C = x_nhwc.shape
    Ho, Wo = H // 2, W // 2
    xp = jnp.pad(x_nhwc.astype(compute_dtype), ((0, 0), (1, 1), (1, 1), (0, 0)))
    cols = [xp[:, :, kw:kw + 2 * Wo:2, :] for kw in range(3)]   # each [B,H+2,Wo,C]
    xw = jnp.stack(cols, axis=3)                                # [B,H+2,Wo,3,C]
    a = xw.reshape(B, Ho + 1, 2, Wo, 3, C)                      # rows -> (rg, p_h)
    a = a.transpose(0, 1, 3, 2, 4, 5)                           # [B,Ho+1,Wo,p_h,kw,C]
    return a.reshape(B, (Ho + 1) * Wo, 6 * C)


def _conv3x3_s2(a, w_a, w_b, bias, *, m_out, row_stride, out_dtype,
                tn_cap=512, tm_cap=512):
    """y[b, m, :] = A[b, m, :] @ Wa + A[b, m + Wo, :3C] @ Wb (+ bias)."""
    B, MA, K6 = a.shape
    K3 = w_b.shape[0]
    Np = w_a.shape[1]
    # largest shifted window must end exactly at MA (no runtime OOB check on VMEM)
    assert MA == m_out + row_stride, (MA, m_out, row_stride)

    tn = _pick_tn(Np, tn_cap)
    nj = Np // tn
    tm = _pick_tm(m_out, tm_cap)
    nm = m_out // tm
    has_bias = bias is not None

    kernel = functools.partial(_conv_kernel, tm=tm, row_stride=row_stride,
                               c3=K3, has_bias=has_bias, num_m_tiles=nm)

    in_specs = [
        # whole image, constant across (j, m) -> DMA'd once per image
        pl.BlockSpec((1, MA, K6), lambda j, b, m: (b, 0, 0)),
        # weights depend only on j (outer axis) -> DMA'd once per call per j
        pl.BlockSpec((K6, tn), lambda j, b, m: (0, j)),
        pl.BlockSpec((K3, tn), lambda j, b, m: (0, j)),
    ]
    inputs = [a, w_a, w_b]
    if has_bias:
        in_specs.append(pl.BlockSpec((1, tn), lambda j, b, m: (0, j)))
        inputs.append(bias)

    return pl.pallas_call(
        kernel,
        grid=(nj, B, nm),
        in_specs=in_specs,
        out_specs=pl.BlockSpec((1, tm, tn), lambda j, b, m: (b, m, j)),
        out_shape=jax.ShapeDtypeStruct((B, m_out, Np), out_dtype),
        compiler_params=pltpu.CompilerParams(
            dimension_semantics=("parallel", "parallel", "parallel"),
            vmem_limit_bytes=48 * 1024 * 1024,
        ),
    )(*inputs)


# ----------------------- one-time parameter preprocessing --------------------

def _build_shift_weights(w_oihw, n_pad, cin_pad=None):
    """PyTorch conv weight [Cout, Cin, 3, 3] -> (Wa [6*cp, Np], Wb [3*cp, Np]).

    Wa[(p_h*3 + kw)*cp + c, o] = W[o, c, p_h, kw]   (kh = p_h in {0, 1})
    Wb[kw*cp + c, o]           = W[o, c, 2,   kw]   (kh = 2)
    """
    cout, cin = w_oihw.shape[0], w_oihw.shape[1]
    cp = cin if cin_pad is None else cin_pad
    w = jnp.asarray(w_oihw, jnp.float32)
    wa = jnp.zeros((6 * cp, n_pad), jnp.float32)
    wb = jnp.zeros((3 * cp, n_pad), jnp.float32)
    for p_h in range(2):
        for kw in range(3):
            s = (p_h * 3 + kw) * cp
            wa = wa.at[s:s + cin, :cout].set(w[:, :, p_h, kw].T)
    for kw in range(3):
        s = kw * cp
        wb = wb.at[s:s + cin, :cout].set(w[:, :, 2, kw].T)
    return wa, wb


def preprocess_params(params, compute_dtype=jnp.bfloat16):
    """Fold the Linear into conv2, build trimmed shift weights, cast once."""
    w1, w2 = params["conv1_w"], params["conv2_w"]
    wp, bp = params["proj_w"], params["proj_b"]
    c_mid = w1.shape[0]            # 2 * vision_output_channels
    lang = wp.shape[0]             # language_hidden_size

    # Exact fold: Linear(conv2(x)) == conv2'(x) + b,  W2'[o,i,:,:] = sum_c Wp[o,c] W2[c,i,:,:]
    w2_folded = jnp.einsum("oc,cihw->oihw", wp.astype(jnp.float32),
                           w2.astype(jnp.float32))

    n1 = _round_up(c_mid, 128)     # lane-padded intermediate channels (zeros)
    n2 = _round_up(lang, 128)
    w1_a, w1_b = _build_shift_weights(w1, n1)
    w2_a, w2_b = _build_shift_weights(w2_folded, n2, cin_pad=n1)
    return {
        "w1_a": w1_a.astype(compute_dtype), "w1_b": w1_b.astype(compute_dtype),
        "w2_a": w2_a.astype(compute_dtype), "w2_b": w2_b.astype(compute_dtype),
        "bias2": jnp.pad(bp.astype(jnp.float32), (0, n2 - lang)).reshape(1, n2),
        "c_mid": c_mid, "lang": lang, "n1": n1,
        "compute_dtype": compute_dtype,
    }


# --------------------------------- forward ----------------------------------

def got_ocr2_multimodal_projector(vision_embeddings_nchw, prep):
    """vision_embeddings_nchw: [B, C_vis, H, W] -> [B, (H//4)*(W//4), lang]."""
    cdt = prep["compute_dtype"]
    B, _, H, W = vision_embeddings_nchw.shape
    Ho1, Wo1 = H // 2, W // 2
    Ho2, Wo2 = Ho1 // 2, Wo1 // 2

    # NCHW -> NHWC in the compute dtype (all layout glue stays bf16)
    x = jnp.transpose(vision_embeddings_nchw.astype(cdt), (0, 2, 3, 1))

    # conv_upsampler1 (no bias); padded output channels are exact zeros
    a1 = _build_act(x, cdt)
    h = _conv3x3_s2(a1, prep["w1_a"], prep["w1_b"], None,
                    m_out=Ho1 * Wo1, row_stride=Wo1, out_dtype=cdt)

    # conv_upsampler2 with the multimodal_projector Linear folded in (+ its bias)
    h = h.reshape(B, Ho1, Wo1, prep["n1"])
    a2 = _build_act(h, cdt)
    out = _conv3x3_s2(a2, prep["w2_a"], prep["w2_b"], prep["bias2"],
                      m_out=Ho2 * Wo2, row_stride=Wo2, out_dtype=jnp.float32)

    # flatten(2).permute(0, 2, 1) in NCHW == row-major NHWC flatten (already is);
    # drop lane padding (no-op at real 1024-dim hidden). Emit bf16 here if the
    # consuming LM runs in bf16.
    return out[:, :, :prep["lang"]]


# --------------------------------- reference ---------------------------------

def _reference(vision_embeddings_nchw, params):
    """Pure-JAX f32 reference mirroring the PyTorch forward (NCHW convs)."""
    dn = ("NCHW", "OIHW", "NCHW")
    h = lax.conv_general_dilated(
        vision_embeddings_nchw, params["conv1_w"], (2, 2), [(1, 1), (1, 1)],
        dimension_numbers=dn)
    h = lax.conv_general_dilated(
        h, params["conv2_w"], (2, 2), [(1, 1), (1, 1)], dimension_numbers=dn)
    B, C, Ho, Wo = h.shape
    h = h.reshape(B, C, Ho * Wo).transpose(0, 2, 1)
    return h @ params["proj_w"].T + params["proj_b"]


# ----------------------------------- driver ----------------------------------

if __name__ == "__main__":
    # Small, config-consistent shapes:
    #   vision_output_channels = 8, language_hidden_size = 32,
    #   spatial 16x16 -> conv1 -> 8x8 -> conv2 -> 4x4 -> seq = 16.
    B, C_VIS, H, W = 2, 8, 16, 16
    C_MID = 2 * C_VIS
    LANG = 32

    key = jax.random.PRNGKey(0)
    k_x, k_w1, k_w2, k_wp, k_bp = jax.random.split(key, 5)

    x = jax.random.normal(k_x, (B, C_VIS, H, W), dtype=jnp.float32)
    params = {
        "conv1_w": 0.05 * jax.random.normal(k_w1, (C_MID, C_VIS, 3, 3), jnp.float32),
        "conv2_w": 0.05 * jax.random.normal(k_w2, (LANG, C_MID, 3, 3), jnp.float32),
        "proj_w": 0.05 * jax.random.normal(k_wp, (LANG, LANG), jnp.float32),
        "proj_b": 0.05 * jax.random.normal(k_bp, (LANG,), jnp.float32),
    }

    ref = _reference(x, params)

    # f32 MXU path: tight check of the kernel structure / weight re-layout.
    prep_f32 = preprocess_params(params, compute_dtype=jnp.float32)
    out_f32 = jax.block_until_ready(
        jax.jit(lambda v: got_ocr2_multimodal_projector(v, prep_f32))(x))
    assert out_f32.shape == (B, (H // 4) * (W // 4), LANG), out_f32.shape
    assert jnp.allclose(out_f32, ref, atol=5e-3, rtol=1e-2), float(
        jnp.max(jnp.abs(out_f32 - ref)))

    # bf16 MXU path (default / fast): looser tolerance vs. the f32 reference.
    prep_bf16 = preprocess_params(params, compute_dtype=jnp.bfloat16)
    out_bf16 = jax.block_until_ready(
        jax.jit(lambda v: got_ocr2_multimodal_projector(v, prep_bf16))(x))
    assert out_bf16.shape == (B, (H // 4) * (W // 4), LANG), out_bf16.shape
    assert jnp.allclose(out_bf16, ref, atol=2e-2, rtol=5e-2), float(
        jnp.max(jnp.abs(out_bf16 - ref)))

    print("KERNEL_OK")
</pallas_src>

<mosaic_0001>
module attributes {stable_mosaic.version = 11 : i64} {
  func.func @_conv_kernel(%arg0: i32, %arg1: i32, %arg2: i32, %arg3: memref<1x72x48xf32, #tpu.memory_space<vmem>>, %arg4: memref<48x128xf32, #tpu.memory_space<vmem>>, %arg5: memref<24x128xf32, #tpu.memory_space<vmem>>, %arg6: memref<1x64x128xf32, #tpu.memory_space<vmem>>) attributes {dimension_semantics = [#tpu.dimension_semantics<parallel>, #tpu.dimension_semantics<parallel>, #tpu.dimension_semantics<parallel>], iteration_bounds = array<i64: 1, 2, 1>, scalar_prefetch = 0 : i64, scratch_operands = 0 : i64, tpu.core_type = #tpu.core_type<tc>, window_params = [{transform_indices = @transform_0, window_bounds = array<i64: 1, 72, 48>}, {transform_indices = @transform_1, window_bounds = array<i64: 48, 128>}, {transform_indices = @transform_2, window_bounds = array<i64: 24, 128>}, {transform_indices = @transform_3, window_bounds = array<i64: 1, 64, 128>}]} {
    %c0 = arith.constant 0 : index
    %c0_0 = arith.constant 0 : index
    %c0_1 = arith.constant 0 : index
    %0 = vector.load %arg3[%c0, %c0_0, %c0_1] : memref<1x72x48xf32, #tpu.memory_space<vmem>>, vector<1x64x48xf32>
    %1 = vector.shape_cast %0 : vector<1x64x48xf32> to vector<64x48xf32>
    %c0_2 = arith.constant 0 : index
    %c0_3 = arith.constant 0 : index
    %2 = vector.load %arg4[%c0_2, %c0_3] : memref<48x128xf32, #tpu.memory_space<vmem>>, vector<48x128xf32>
    %cst = arith.constant dense<0.000000e+00> : vector<64x128xf32>
    %3 = tpu.matmul %1, %2, %cst {dimension_numbers = #tpu.dot_dimension_numbers<[1], [0], [0], [1], [0, 0, 1, 1], [], []>} : vector<64x48xf32>, vector<48x128xf32>, vector<64x128xf32> -> vector<64x128xf32>
    %c0_4 = arith.constant 0 : index
    %c8 = arith.constant 8 : index
    %c0_5 = arith.constant 0 : index
    %4 = vector.load %arg3[%c0_4, %c8, %c0_5] : memref<1x72x48xf32, #tpu.memory_space<vmem>>, vector<1x64x24xf32>
    %5 = vector.shape_cast %4 : vector<1x64x24xf32> to vector<64x24xf32>
    %c0_6 = arith.constant 0 : index
    %c0_7 = arith.constant 0 : index
    %6 = vector.load %arg5[%c0_6, %c0_7] : memref<24x128xf32, #tpu.memory_space<vmem>>, vector<24x128xf32>
    %cst_8 = arith.constant dense<0.000000e+00> : vector<64x128xf32>
    %7 = tpu.matmul %5, %6, %cst_8 {dimension_numbers = #tpu.dot_dimension_numbers<[1], [0], [0], [1], [0, 0, 1, 1], [], []>} : vector<64x24xf32>, vector<24x128xf32>, vector<64x128xf32> -> vector<64x128xf32>
    %8 = arith.addf %3, %7 : vector<64x128xf32>
    %c0_9 = arith.constant 0 : index
    %c0_10 = arith.constant 0 : index
    %c0_11 = arith.constant 0 : index
    %9 = vector.load %arg6[%c0_9, %c0_10, %c0_11] : memref<1x64x128xf32, #tpu.memory_space<vmem>>, vector<1x64x128xf32>
    %10 = vector.shape_cast %9 : vector<1x64x128xf32> to vector<64x128xf32>
    %11 = vector.shape_cast %8 : vector<64x128xf32> to vector<1x64x128xf32>
    tpu.vector_store %arg6[%c0_9, %c0_10, %c0_11], %11 {strides = array<i32>} : memref<1x64x128xf32, #tpu.memory_space<vmem>>, vector<1x64x128xf32>,
    return
  }
  func.func @transform_0(%arg0: i32, %arg1: i32, %arg2: i32) -> (i32, i32, i32) {
    %c0_i32 = arith.constant 0 : i32
    %c0_i32_0 = arith.constant 0 : i32
    %c0_i32_1 = arith.constant 0 : i32
    return %arg1, %c0_i32, %c0_i32_0 : i32, i32, i32
  }
  func.func @transform_1(%arg0: i32, %arg1: i32, %arg2: i32) -> (i32, i32) {
    %c0_i32 = arith.constant 0 : i32
    %c0_i32_0 = arith.constant 0 : i32
    return %c0_i32, %arg0 : i32, i32
  }
  func.func @transform_2(%arg0: i32, %arg1: i32, %arg2: i32) -> (i32, i32) {
    %c0_i32 = arith.constant 0 : i32
    %c0_i32_0 = arith.constant 0 : i32
    return %c0_i32, %arg0 : i32, i32
  }
  func.func @transform_3(%arg0: i32, %arg1: i32, %arg2: i32) -> (i32, i32, i32) {
    %c0_i32 = arith.constant 0 : i32
    return %arg1, %arg2, %arg0 : i32, i32, i32
  }
}

module attributes {stable_mosaic.version = 11 : i64} {
  func.func @_conv_kernel(%arg0: i32, %arg1: i32, %arg2: i32, %arg3: memref<1x20x768xf32, #tpu.memory_space<vmem>>, %arg4: memref<768x128xf32, #tpu.memory_space<vmem>>, %arg5: memref<384x128xf32, #tpu.memory_space<vmem>>, %arg6: memref<1x128xf32, #tpu.memory_space<vmem>>, %arg7: memref<1x16x128xf32, #tpu.memory_space<vmem>>) attributes {dimension_semantics = [#tpu.dimension_semantics<parallel>, #tpu.dimension_semantics<parallel>, #tpu.dimension_semantics<parallel>], iteration_bounds = array<i64: 1, 2, 1>, scalar_prefetch = 0 : i64, scratch_operands = 0 : i64, tpu.core_type = #tpu.core_type<tc>, window_params = [{transform_indices = @transform_0, window_bounds = array<i64: 1, 20, 768>}, {transform_indices = @transform_1, window_bounds = array<i64: 768, 128>}, {transform_indices = @transform_2, window_bounds = array<i64: 384, 128>}, {transform_indices = @transform_3, window_bounds = array<i64: 1, 128>}, {transform_indices = @transform_4, window_bounds = array<i64: 1, 16, 128>}]} {
    %c0 = arith.constant 0 : index
    %c0_0 = arith.constant 0 : index
    %c0_1 = arith.constant 0 : index
    %0 = vector.load %arg3[%c0, %c0_0, %c0_1] : memref<1x20x768xf32, #tpu.memory_space<vmem>>, vector<1x16x768xf32>
    %1 = vector.shape_cast %0 : vector<1x16x768xf32> to vector<16x768xf32>
    %c0_2 = arith.constant 0 : index
    %c0_3 = arith.constant 0 : index
    %2 = vector.load %arg4[%c0_2, %c0_3] : memref<768x128xf32, #tpu.memory_space<vmem>>, vector<768x128xf32>
    %cst = arith.constant dense<0.000000e+00> : vector<16x128xf32>
    %3 = tpu.matmul %1, %2, %cst {dimension_numbers = #tpu.dot_dimension_numbers<[1], [0], [0], [1], [0, 0, 1, 1], [], []>} : vector<16x768xf32>, vector<768x128xf32>, vector<16x128xf32> -> vector<16x128xf32>
    %c0_4 = arith.constant 0 : index
    %c4 = arith.constant 4 : index
    %c0_5 = arith.constant 0 : index
    %4 = vector.load %arg3[%c0_4, %c4, %c0_5] : memref<1x20x768xf32, #tpu.memory_space<vmem>>, vector<1x16x384xf32>
    %5 = vector.shape_cast %4 : vector<1x16x384xf32> to vector<16x384xf32>
    %c0_6 = arith.constant 0 : index
    %c0_7 = arith.constant 0 : index
    %6 = vector.load %arg5[%c0_6, %c0_7] : memref<384x128xf32, #tpu.memory_space<vmem>>, vector<384x128xf32>
    %cst_8 = arith.constant dense<0.000000e+00> : vector<16x128xf32>
    %7 = tpu.matmul %5, %6, %cst_8 {dimension_numbers = #tpu.dot_dimension_numbers<[1], [0], [0], [1], [0, 0, 1, 1], [], []>} : vector<16x384xf32>, vector<384x128xf32>, vector<16x128xf32> -> vector<16x128xf32>
    %8 = arith.addf %3, %7 : vector<16x128xf32>
    %c0_9 = arith.constant 0 : index
    %c0_10 = arith.constant 0 : index
    %9 = vector.load %arg6[%c0_9, %c0_10] : memref<1x128xf32, #tpu.memory_space<vmem>>, vector<1x128xf32>
    %10 = vector.broadcast %9 : vector<1x128xf32> to vector<16x128xf32>
    %11 = arith.addf %8, %10 : vector<16x128xf32>
    %c0_11 = arith.constant 0 : index
    %c0_12 = arith.constant 0 : index
    %c0_13 = arith.constant 0 : index
    %12 = vector.load %arg7[%c0_11, %c0_12, %c0_13] : memref<1x16x128xf32, #tpu.memory_space<vmem>>, vector<1x16x128xf32>
    %13 = vector.shape_cast %12 : vector<1x16x128xf32> to vector<16x128xf32>
    %14 = vector.shape_cast %11 : vector<16x128xf32> to vector<1x16x128xf32>
    tpu.vector_store %arg7[%c0_11, %c0_12, %c0_13], %14 {strides = array<i32>} : memref<1x16x128xf32, #tpu.memory_space<vmem>>, vector<1x16x128xf32>,
    return
  }
  func.func @transform_0(%arg0: i32, %arg1: i32, %arg2: i32) -> (i32, i32, i32) {
    %c0_i32 = arith.constant 0 : i32
    %c0_i32_0 = arith.constant 0 : i32
    %c0_i32_1 = arith.constant 0 : i32
    return %arg1, %c0_i32, %c0_i32_0 : i32, i32, i32
  }
  func.func @transform_1(%arg0: i32, %arg1: i32, %arg2: i32) -> (i32, i32) {
    %c0_i32 = arith.constant 0 : i32
    %c0_i32_0 = arith.constant 0 : i32
    return %c0_i32, %arg0 : i32, i32
  }
  func.func @transform_2(%arg0: i32, %arg1: i32, %arg2: i32) -> (i32, i32) {
    %c0_i32 = arith.constant 0 : i32
    %c0_i32_0 = arith.constant 0 : i32
    return %c0_i32, %arg0 : i32, i32
  }
  func.func @transform_3(%arg0: i32, %arg1: i32, %arg2: i32) -> (i32, i32) {
    %c0_i32 = arith.constant 0 : i32
    %c0_i32_0 = arith.constant 0 : i32
    return %c0_i32, %arg0 : i32, i32
  }
  func.func @transform_4(%arg0: i32, %arg1: i32, %arg2: i32) -> (i32, i32, i32) {
    %c0_i32 = arith.constant 0 : i32
    return %arg1, %arg2, %arg0 : i32, i32, i32
  }
}

</mosaic_0001>

<bundles_post_ra>
// kernel: _lambda_.2
= control target key start
LH: loop header
LB: loop body
LE: loop exit
PB: predicated region body
PF: predicated region fallthrough
CT: control target
= control target key end

     0   :  { %s841_s12 = smov 0   ;;  %s843_s13 = smov 0   ;;  %s932_s0 = inlined_call_operand.vmem [shape: f32[2,72,48], index: 0, kind: input, shape index: {}]   ;;  %s933_s1 = inlined_call_operand.vmem [shape: f32[48,128], index: 1, kind: input, shape index: {}]   ;;  %s934_s2 = inlined_call_operand.vmem [shape: f32[24,128], index: 2, kind: input, shape index: {}]   ;;  %s935_s3 = inlined_call_operand.vmem [shape: f32[2,64,128], index: 3, kind: output, shape index: {}]  }
   0x1   :  { %s845_s14 = smov 0  }
   0x2 LB: > { %s28_s15 = sadd.s32 1, %s815_s13  ;;  %p652_p0 = scmp.ge.s32.totalorder %s819_s14, 1  ;;  %s819_s14 = sphi %s845_s14, %s13_s14   ;;  %s815_s13 = sphi %s843_s13, %s937_s13   ;;  %s811_s12 = sphi %s841_s12, %s936_s12  }
   0x3   : > { %p30_p1 = scmp.ge.s32.totalorder %s28_s15, 2  ;;  %p178_p2 = scmp.lt.s32.totalorder %s819_s14, 3 }
   0x5   : > { %s939_s15 = smov (%p30_p1, %s28_s15), 0  ;;  %p179_p3 = pnand %p652_p0, %p178_p2 }
   0x6   : > { %v258_v0 = vld [vmem:[%s934_s2] sm:$0xff] (!%p179_p3)  ;;  %v259_v1 = vld [vmem:[%s934_s2 + $0x8] sm:$0xff] (!%p179_p3)  ;;  %p217_p4 = scmp.lt.s32.totalorder (!%p179_p3), %s811_s12, 1  ;;  %v253_v5 = vld [vmem:[%s933_s1 + $0x10] sm:$0xff] (!%p179_p3)  ;;  %vm261_vm0 = vcmask (!%p179_p3), 195584   ;;  %vm391_vm1 = vcmask (!%p179_p3), 392192  }
   0x7   : > { %182 = sbr.rel (%p179_p3) target bundleno = 250 (0xfa), region = 32  ;;  %v251_v2 = vld [vmem:[%s933_s1] sm:$0xff] (!%p179_p3)  ;;  %v742_v3 = vpack.c.bf16 (!%p179_p3), %v259_v1, %v258_v0  ;;  %v252_v4 = vld [vmem:[%s933_s1 + $0x8] sm:$0xff] (!%p179_p3)  ;;  %v260_v7 = vld [vmem:[%s934_s2 + $0x10] sm:$0xff] (!%p179_p3) }
   0x8   : > { %v746_v6 = vpack.c.bf16 (!%p179_p3), %v252_v4, %v251_v2  ;;  %v254_v8 = vld [vmem:[%s933_s1 + $0x18] sm:$0xff] (!%p179_p3)  ;;  %v255_v10 = vld [vmem:[%s933_s1 + $0x20] sm:$0xff] (!%p179_p3)  ;;  %v256_v11 = vld [vmem:[%s933_s1 + $0x28] sm:$0xff] (!%p179_p3) }
   0x9   : > { %743 = vmatprep.subr.bf16.mxu0 (!%p179_p3), %v742_v3  ;;  %v750_v9 = vpack.c.bf16 (!%p179_p3), %v254_v8, %v253_v5  ;;  %v754_v12 = vpack.c.bf16 (!%p179_p3), %v256_v11, %v255_v10 }
   0xa   : > { %758 = vmatprep.subr.bf16.mxu1 (!%p179_p3), %v746_v6  ;;  %745 = vmatpush3.bf16.msra.mxu0 (!%p179_p3), %v742_v3 }
   0xb   : > { %761 = vmatpush3.bf16.msra.mxu1 (!%p179_p3), %v746_v6  ;;  %704 = vmatprep.subr.mxu0 (!%p179_p3), %v260_v7 }
   0xc   : > { %759 = vmatprep.subr.bf16.mxu1 (!%p179_p3), %v750_v9 }
   0xe   : > { %s941_s12 = smov (!%p217_p4, %s811_s12), 1  ;;  %705 = vmatpush3.msra.mxu0 %v260_v7 }
   0xf   : > { %s772_s7 = smul.u32 72, %s941_s12  ;;  %762 = vmatpush3.bf16.msra.mxu1 %v750_v9  ;;  %747 = vmatprep.subr.bf16.mxu0 %v746_v6  ;;  %s674_s11 = sshll.u32 %s941_s12, 6 }
  0x10   : > { %760 = vmatprep.subr.bf16.mxu1 %v754_v12  ;;  %s241_s18 = scalar_lea.vmem %s935_s3, %s674_s11 }
  0x11   : > { %s892_s10 = scalar_lea.vmem %s932_s0, %s772_s7 }
  0x12   : > { %v244_v13 = vld [vmem:[%s892_s10 + $0x8] sm:$0xff]  ;;  %v245_v14 = vld [vmem:[%s892_s10 + $0x10] sm:$0xff]  ;;  %v246_v15 = vld [vmem:[%s892_s10 + $0x18] sm:$0xff] }
  0x13   : > { %706 = vmatprep.mubr.msk.f32.mxu0 %vm261_vm0, %v244_v13  ;;  %v247_v16 = vld [vmem:[%s892_s10 + $0x20] sm:$0xff]  ;;  %v248_v17 = vld [vmem:[%s892_s10 + $0x28] sm:$0xff]  ;;  %733 = vmatprep.mubr.msk.f32.mxu1 %vm391_vm1, %v245_v14  ;;  %v249_v18 = vld [vmem:[%s892_s10 + $0x30] sm:$0xff] }
  0x14   : > { %707 = vmatmul.mubr.msk.f32.vlgmr.msra.gmra.mrb[0].mxu0 %vm261_vm0, %v245_v14  ;;  %763 = vmatpush3.bf16.msra.mxu1 %v754_v12  ;;  %v250_v19 = vld [vmem:[%s892_s10 + $0x38] sm:$0xff]  ;;  %v257_v20 = vld [vmem:[%s892_s10 + $0x40] sm:$0xff] }
  0x15   : > { %749 = vmatpush3.bf16.msra.mxu0 %v746_v6  ;;  %709 = vmatprep.mubr.msk.f32.mxu0 %vm261_vm0, %v246_v15  ;;  %v243_v21 = vld [vmem:[%s892_s10] sm:$0xff] }
  0x16   : > { %751 = vmatprep.subr.bf16.mxu0 %v750_v9 }
  0x17   : > { %734 = vmatmul.mubr.msk.f32.vlgmr.msra.gmra.mrb[0].mxu1 %vm391_vm1, %v246_v15 }
  0x18   : > { %710 = vmatmul.mubr.msk.f32.gmra.mrb[2].mxu0 %vm261_vm0, %v247_v16  ;;  %736 = vmatprep.mubr.msk.f32.mxu1 %vm391_vm1, %v247_v16 }
  0x19   : > { %712 = vmatprep.mubr.msk.f32.mxu0 %vm261_vm0, %v248_v17  ;;  %753 = vmatpush3.bf16.msra.mxu0 %v750_v9 }
  0x1a   : > { %755 = vmatprep.subr.bf16.mxu0 %v754_v12 }
  0x1b   : > { %737 = vmatmul.mubr.msk.f32.gmra.mrb[2].mxu1 %vm391_vm1, %v248_v17 }
  0x1c   : > { %713 = vmatmul.mubr.msk.f32.gmra.mrb[4].mxu0 %vm261_vm0, %v249_v18  ;;  %739 = vmatprep.mubr.msk.f32.mxu1 %vm391_vm1, %v249_v18 }
  0x1d   : > { %715 = vmatprep.mubr.msk.f32.mxu0 %vm261_vm0, %v250_v19  ;;  %757 = vmatpush3.bf16.msra.mxu0 %v754_v12 }
  0x1f   : > { %740 = vmatmul.mubr.msk.f32.gmra.mrb[4].mxu1 %vm391_vm1, %v250_v19 }
  0x20   : > { %716 = vmatmul.mubr.msk.f32.gmra.mrb[6].mxu0 %vm261_vm0, %v257_v20 }
  0x21   : > { %730 = vmatprep.mubr.msk.f32.mxu0 %vm391_vm1, %v243_v21 }
  0x24   : > { %731 = vmatmul.mubr.msk.f32.vlgmr.msra.gmra.mrb[0].mxu0 %vm391_vm1, %v244_v13 }
  0xea   : > { %v735_v24 = vpop.f32.mrb[0].mxu1 }
  0xeb   : > { %v711_v22 = vpop.f32.mrb[2].mxu0  ;;  %v485_v26 = vpop.f32.mrb[1].mxu1 }
  0xec   : > { %v362_v23 = vpop.f32.mrb[3].mxu0  ;;  %v491_v25 = vadd.f32 %v735_v24, %v711_v22 }
  0xed   : > { %v486_v28 = vadd.f32 %v485_v26, %v362_v23 }
  0xee   : > { %517 = vst [vmem:[%s241_s18 + $0x18] sm:$0xff] %v491_v25  ;;  %v738_v30 = vpop.f32.mrb[2].mxu1 }
  0xef   : > { %v714_v27 = vpop.f32.mrb[4].mxu0  ;;  %516 = vst [vmem:[%s241_s18 + $0x10] sm:$0xff] %v486_v28  ;;  %v495_v32 = vpop.f32.mrb[3].mxu1 }
  0xf0   : > { %v372_v29 = vpop.f32.mrb[5].mxu0  ;;  %v501_v31 = vadd.f32 %v738_v30, %v714_v27 }
  0xf1   : > { %v496_v34 = vadd.f32 %v495_v32, %v372_v29 }
  0xf2   : > { %519 = vst [vmem:[%s241_s18 + $0x28] sm:$0xff] %v501_v31  ;;  %v741_v36 = vpop.f32.mrb[4].mxu1 }
  0xf3   : > { %v717_v33 = vpop.f32.mrb[6].mxu0  ;;  %518 = vst [vmem:[%s241_s18 + $0x20] sm:$0xff] %v496_v34  ;;  %v505_v38 = vpop.f32.mrb[5].mxu1 }
  0xf4   : > { %v382_v35 = vpop.f32.mrb[7].mxu0  ;;  %v511_v37 = vadd.f32 %v741_v36, %v717_v33 }
  0xf5   : > { %v506_v40 = vadd.f32 %v505_v38, %v382_v35 }
  0xf6   : > { %521 = vst [vmem:[%s241_s18 + $0x38] sm:$0xff] %v511_v37 }
  0xf7   : > { %v732_v39 = vpop.f32.mrb[0].mxu0  ;;  %520 = vst [vmem:[%s241_s18 + $0x30] sm:$0xff] %v506_v40 }
  0xf8   : > { %515 = vst [vmem:[%s241_s18 + $0x8] sm:$0xff] %v732_v39  ;;  %v475_v41 = vpop.f32.mrb[1].mxu0 }
  0xf9   : > { %514 = vst [vmem:[%s241_s18] sm:$0xff] %v475_v41 }
  0xfa PF: > { %s13_s14 = sadd.s32 1, %s819_s14   ;;  %s936_s12 = smov %s815_s13 }
  0xfb   : > { %p10_p5 = scmp.ge.s32.totalorder %s13_s14, 4   ;;  %s937_s13 = smov %s939_s15 }
  0xfd   :  { %12 = sbr.rel (!%p10_p5) target bundleno = 2 (0x2), region = 68 }

// kernel: _lambda_.3
= control target key start
LH: loop header
LB: loop body
LE: loop exit
PB: predicated region body
PF: predicated region fallthrough
CT: control target
= control target key end

     0   :  { %9 = vsyncpa [#allocation3], 0  ;;  %s2148_s0 = inlined_call_operand.vmem [shape: f32[2,20,768], index: 0, kind: input, shape index: {}]   ;;  %s2149_s1 = inlined_call_operand.vmem [shape: f32[768,128], index: 1, kind: input, shape index: {}]   ;;  %s2150_s2 = inlined_call_operand.vmem [shape: f32[384,128], index: 2, kind: input, shape index: {}]   ;;  %s2151_s3 = inlined_call_operand.vmem [shape: f32[1,128], index: 3, kind: input, shape index: {}]   ;;  %s2152_s4 = inlined_call_operand.hbm [shape: f32[2,16,128], index: 4, kind: output, shape index: {}]  }
   0x1   :  { %11 = vsyncpa [#allocation3 + $0x1], 0  ;;  %s1547_s15 = smov 0   ;;  %s1549_s16 = smov 0  }
   0x2   :  { %s1551_s17 = smov 0   ;;  %s1553_s18 = smov 0  }
   0x3   :  { %s1555_s19 = smov 0   ;;  %s1557_s20 = smov 0  }
   0x4 LB: > { %s983_s21 = sadd.s32 4294967295, %s1517_s20   ;;  %s984_s22 = sadd.s32 4294967294, %s1517_s20   ;;  %s1517_s20 = sphi %s1557_s20, %s17_s20   ;;  %s1513_s19 = sphi %s1555_s19, %s2159_s19   ;;  %s1509_s18 = sphi %s1553_s18, %s2158_s18   ;;  %s1505_s17 = sphi %s1551_s17, %s2157_s17   ;;  %s1501_s16 = sphi %s1549_s16, %s2156_s16   ;;  %s1497_s15 = sphi %s1547_s15, %s2155_s15  }
   0x5   : > { %s32_s23 = sadd.s32 1, %s1513_s19  ;;  %s151_s24 = sadd.s32 1, %s1505_s17 }
   0x6   : > { %p34_p0 = scmp.ge.s32.totalorder %s32_s23, 2  ;;  %p161_p1 = scmp.ne.s32.totalorder %s1505_s17, %s1501_s16 }
   0x7   : > { %p162_p2 = scmp.eq.s32.totalorder %s983_s21, 1  ;;  %p167_p3 = scmp.ne.s32.totalorder %s1501_s16, %s1497_s15 }
   0x8   : > { %s2161_s23 = smov (%p34_p0, %s32_s23), 0  ;;  %p168_p5 = scmp.eq.s32.totalorder %s984_s22, 1 }
   0x9   : > { %p1587_p4 = por %p162_p2, %p161_p1  ;;  %s144_s26 = ssub.s32 %s1513_s19, %s2161_s23 }
   0xa   : > { %p990_p6 = scmp.ge.s32.totalorder %s1517_s20, 1  ;;  %p149_p7 = scmp.eq.s32.totalorder %s144_s26, 0 }
   0xb   : > { %p1594_p8 = por %p168_p5, %p167_p3  ;;  %p214_p9 = scmp.lt.s32.totalorder %s1517_s20, 3 }
   0xc   : > { %s1600_s28 = scalar_select %p149_p7, %s1505_s17, %s151_s24  }
   0xd   : > { %p215_p10 = pnand %p990_p6, %p214_p9 }
   0xe   : > { %v398_v0 = vld [vmem:[%s2150_s2 + $0x80] sm:$0xff] (!%p215_p10)  ;;  %v399_v1 = vld [vmem:[%s2150_s2 + $0x88] sm:$0xff] (!%p215_p10)  ;;  %p251_p11 = scmp.lt.s32.totalorder (!%p215_p10), %s1509_s18, 1  ;;  %v400_v9 = vld [vmem:[%s2150_s2 + $0x90] sm:$0xff] (!%p215_p10)  ;;  %vm439_vm0 = vcmask (!%p215_p10), 1043456   ;;  %s999_s13 = sshll.u32 (!%p215_p10), %s1509_s18, 8 }
   0xf   : > { %218 = sbr.rel (%p215_p10) target bundleno = 348 (0x15c), region = 36  ;;  %v414_v2 = vld [vmem:[%s2150_s2 + $0x100] sm:$0xff] (!%p215_p10)  ;;  %v1205_v3 = vpack.c.bf16 (!%p215_p10), %v399_v1, %v398_v0  ;;  %v415_v4 = vld [vmem:[%s2150_s2 + $0x108] sm:$0xff] (!%p215_p10)  ;;  %v401_v10 = vld [vmem:[%s2150_s2 + $0x98] sm:$0xff] (!%p215_p10)  ;;  %s2100_s21 = scalar_lea.hbm (!%p215_p10), %s2152_s4, %s999_s13 }
  0x10   : > { %v382_v5 = vld [vmem:[%s2150_s2] sm:$0xff] (!%p215_p10)  ;;  %v383_v6 = vld [vmem:[%s2150_s2 + $0x8] sm:$0xff] (!%p215_p10)  ;;  %v1237_v7 = vpack.c.bf16 (!%p215_p10), %v415_v4, %v414_v2  ;;  %v416_v11 = vld [vmem:[%s2150_s2 + $0x110] sm:$0xff] (!%p215_p10)  ;;  %v1209_v12 = vpack.c.bf16 (!%p215_p10), %v401_v10, %v400_v9 }
  0x11   : > { %v1207_v8 = vpack.c.bf16 (!%p215_p10), %v383_v6, %v382_v5  ;;  %1206 = vmatprep.subr.bf16.mxu0 (!%p215_p10), %v1205_v3  ;;  %v417_v13 = vld [vmem:[%s2150_s2 + $0x118] sm:$0xff] (!%p215_p10)  ;;  %v384_v14 = vld [vmem:[%s2150_s2 + $0x10] sm:$0xff] (!%p215_p10)  ;;  %v402_v18 = vld [vmem:[%s2150_s2 + $0xa0] sm:$0xff] (!%p215_p10) }
  0x12   : > { %v385_v15 = vld [vmem:[%s2150_s2 + $0x18] sm:$0xff] (!%p215_p10)  ;;  %1238 = vmatprep.subr.bf16.mxu1 (!%p215_p10), %v1237_v7  ;;  %v1241_v16 = vpack.c.bf16 (!%p215_p10), %v417_v13, %v416_v11  ;;  %v403_v19 = vld [vmem:[%s2150_s2 + $0xa8] sm:$0xff] (!%p215_p10)  ;;  %v418_v20 = vld [vmem:[%s2150_s2 + $0x120] sm:$0xff] (!%p215_p10) }
  0x13   : > { %1208 = vmatpush3.bf16.msra.mxu0 (!%p215_p10), %v1207_v8  ;;  %v1211_v17 = vpack.c.bf16 (!%p215_p10), %v385_v15, %v384_v14  ;;  %1240 = vmatpush3.bf16.msra.mxu1 (!%p215_p10), %v1237_v7  ;;  %v1213_v21 = vpack.c.bf16 (!%p215_p10), %v403_v19, %v402_v18  ;;  %v419_v22 = vld [vmem:[%s2150_s2 + $0x128] sm:$0xff] (!%p215_p10)  ;;  %v386_v23 = vld [vmem:[%s2150_s2 + $0x20] sm:$0xff] (!%p215_p10)  ;;  %v404_v26 = vld [vmem:[%s2150_s2 + $0xb0] sm:$0xff] (!%p215_p10) }
  0x14   : > { %1210 = vmatprep.subr.bf16.mxu0 (!%p215_p10), %v1209_v12  ;;  %v387_v24 = vld [vmem:[%s2150_s2 + $0x28] sm:$0xff] (!%p215_p10)  ;;  %1242 = vmatprep.subr.bf16.mxu1 (!%p215_p10), %v1241_v16  ;;  %v1245_v25 = vpack.c.bf16 (!%p215_p10), %v419_v22, %v418_v20  ;;  %v405_v27 = vld [vmem:[%s2150_s2 + $0xb8] sm:$0xff] (!%p215_p10)  ;;  %v420_v28 = vld [vmem:[%s2150_s2 + $0x130] sm:$0xff] (!%p215_p10) }
  0x15   : > { %v421_v29 = vld [vmem:[%s2150_s2 + $0x138] sm:$0xff] (!%p215_p10)  ;;  %v1215_v30 = vpack.c.bf16 (!%p215_p10), %v387_v24, %v386_v23  ;;  %v1217_v31 = vpack.c.bf16 (!%p215_p10), %v405_v27, %v404_v26  ;;  %v388_v32 = vld [vmem:[%s2150_s2 + $0x30] sm:$0xff] (!%p215_p10)  ;;  %v406_v35 = vld [vmem:[%s2150_s2 + $0xc0] sm:$0xff] (!%p215_p10) }
  0x16   : > { %s1660_s7 = scalar_select %p251_p11, %s1509_s18, 1  ;;  %v389_v33 = vld [vmem:[%s2150_s2 + $0x38] sm:$0xff]  ;;  %v1249_v34 = vpack.c.bf16 %v421_v29, %v420_v28  ;;  %v407_v36 = vld [vmem:[%s2150_s2 + $0xc8] sm:$0xff]  ;;  %v422_v37 = vld [vmem:[%s2150_s2 + $0x140] sm:$0xff] }
  0x17   : > { %1212 = vmatpush3.bf16.msra.mxu0 %v1211_v17  ;;  %1244 = vmatpush3.bf16.msra.mxu1 %v1241_v16  ;;  %v423_v38 = vld [vmem:[%s2150_s2 + $0x148] sm:$0xff]  ;;  %v1219_v39 = vpack.c.bf16 %v389_v33, %v388_v32  ;;  %v1221_v40 = vpack.c.bf16 %v407_v36, %v406_v35  ;;  %v390_v41 = vld [vmem:[%s2150_s2 + $0x40] sm:$0xff]  ;;  %v408_v44 = vld [vmem:[%s2150_s2 + $0xd0] sm:$0xff]  ;;  %s1519_s18 = smov [#allocation2]  }
  0x18   : > { %1214 = vmatprep.subr.bf16.mxu0 %v1213_v21  ;;  %s1381_s30 = smul.u32 144, %s1660_s7  ;;  %1246 = vmatprep.subr.bf16.mxu1 %v1245_v25  ;;  %v391_v42 = vld [vmem:[%s2150_s2 + $0x48] sm:$0xff]  ;;  %v1253_v43 = vpack.c.bf16 %v423_v38, %v422_v37  ;;  %v409_v45 = vld [vmem:[%s2150_s2 + $0xd8] sm:$0xff]  ;;  %v424_v46 = vld [vmem:[%s2150_s2 + $0x150] sm:$0xff]  ;;  %s1443_s26 = sshll.u32 %s1519_s18, 4  ;;  %s1444_s26 = int_to_ptr.vmem [resolvable:$false] %s1443_s26 }
  0x19   : > { %v425_v47 = vld [vmem:[%s2150_s2 + $0x158] sm:$0xff]  ;;  %v392_v48 = vld [vmem:[%s2150_s2 + $0x50] sm:$0xff]  ;;  %v1223_v49 = vpack.c.bf16 %v391_v42, %v390_v41  ;;  %v1225_v53 = vpack.c.bf16 %v409_v45, %v408_v44  ;;  %v410_v60 = vld [vmem:[%s2150_s2 + $0xe0] sm:$0xff]  ;;  %s1445_s5 = scalar_lea.vmem %s1444_s26, 512 }
  0x1a   : > { %s1702_s29 = scalar_lea.vmem %s2148_s0, %s1381_s30  ;;  %v393_v54 = vld [vmem:[%s2150_s2 + $0x58] sm:$0xff]  ;;  %v1257_v59 = vpack.c.bf16 %v425_v47, %v424_v46  ;;  %v411_v61 = vld [vmem:[%s2150_s2 + $0xe8] sm:$0xff]  ;;  %v426_v63 = vld [vmem:[%s2150_s2 + $0x160] sm:$0xff] }
  0x1b   : > { %1216 = vmatpush3.bf16.msra.mxu0 %v1215_v30  ;;  %1248 = vmatpush3.bf16.msra.mxu1 %v1245_v25  ;;  %v1720_v50 = vld [vmem:[%s1702_s29 + $0x38] sm:$0xff]  ;;  %v377_v51 = vld [vmem:[%s1702_s29 + $0x8] sm:$0xf0]  ;;  %v1724_v52 = vld [vmem:[%s1702_s29 + $0x40] sm:$0xff]  ;;  %v1227_v2 = vpack.c.bf16 %v393_v54, %v392_v48  ;;  %v1229_v4 = vpack.c.bf16 %v411_v61, %v410_v60 }
  0x1c   : > { %1218 = vmatprep.subr.bf16.mxu0 %v1217_v31  ;;  %1250 = vmatprep.subr.bf16.mxu1 %v1249_v34  ;;  %v443_v55 = vrot.slane %v377_v51, 4  ;;  %v444_v56 = vrot.slane %v1720_v50, 4  ;;  %v378_v57 = vld [vmem:[%s1702_s29 + $0x10] sm:$0xf0]  ;;  %v447_v58 = vrot.slane %v1724_v52, 4  ;;  %v427_v0 = vld [vmem:[%s2150_s2 + $0x168] sm:$0xff] }
  0x1d   : > { %v446_v62 = vrot.slane %v378_v57, 4  ;;  %v394_v5 = vld [vmem:[%s2150_s2 + $0x60] sm:$0xff]  ;;  %v395_v6 = vld [vmem:[%s2150_s2 + $0x68] sm:$0xff]  ;;  %v1261_v7 = vpack.c.bf16 %v427_v0, %v426_v63  ;;  %v412_v8 = vld [vmem:[%s2150_s2 + $0xf0] sm:$0xff] }
  0x1e   : > { %v445_v1 = vsel %vm439_vm0, %v443_v55, %v444_v56  ;;  %v413_v9 = vld [vmem:[%s2150_s2 + $0xf8] sm:$0xff]  ;;  %v428_v10 = vld [vmem:[%s2150_s2 + $0x170] sm:$0xff]  ;;  %v1231_v12 = vpack.c.bf16 %v395_v6, %v394_v5  ;;  %v376_v17 = vld [vmem:[%s1702_s29] sm:$0xf0] }
  0x1f   : > { %1220 = vmatpush3.bf16.msra.mxu0 %v1219_v39  ;;  %1252 = vmatpush3.bf16.msra.mxu1 %v1249_v34  ;;  %v448_v3 = vsel %vm439_vm0, %v446_v62, %v447_v58  ;;  %v429_v11 = vld [vmem:[%s2150_s2 + $0x178] sm:$0xff]  ;;  %v396_v13 = vld [vmem:[%s2150_s2 + $0x70] sm:$0xff]  ;;  %v1233_v14 = vpack.c.bf16 %v413_v9, %v412_v8  ;;  %v296_v20 = vld [vmem:[%s2149_s1 + $0x80] sm:$0xff]  ;;  %v440_v26 = vrot.slane %v376_v17, 4 }
  0x20   : > { %1222 = vmatprep.subr.bf16.mxu0 %v1221_v40  ;;  %1254 = vmatprep.subr.bf16.mxu1 %v1253_v43  ;;  %v397_v15 = vld [vmem:[%s2150_s2 + $0x78] sm:$0xff]  ;;  %v1775_v16 = vld [vmem:[%s1702_s29 + $0x30] sm:$0xff]  ;;  %v1265_v18 = vpack.c.bf16 %v429_v11, %v428_v10  ;;  %v297_v21 = vld [vmem:[%s2149_s1 + $0x88] sm:$0xff] }
  0x21   : > { %525 = vmatprep.mubr.f32.mxu0 %v445_v1  ;;  %1202 = vmatprep.mubr.f32.mxu1 %v448_v3  ;;  %v381_v19 = vld [vmem:[%s1702_s29 + $0x70] sm:$0xf]  ;;  %v328_v22 = vld [vmem:[%s2149_s1 + $0x180] sm:$0xff]  ;;  %v329_v23 = vld [vmem:[%s2149_s1 + $0x188] sm:$0xff]  ;;  %v1235_v25 = vpack.c.bf16 %v397_v15, %v396_v13  ;;  %v441_v27 = vrot.slane %v1775_v16, 4  ;;  %v1269_v29 = vpack.c.bf16 %v297_v21, %v296_v20 }
  0x22   : > { %v380_v24 = vld [vmem:[%s1702_s29 + $0x68] sm:$0xf]  ;;  %v453_v28 = vrot.slane %v381_v19, 4  ;;  %v280_v30 = vld [vmem:[%s2149_s1] sm:$0xff]  ;;  %v1301_v33 = vpack.c.bf16 %v329_v23, %v328_v22  ;;  %v298_v37 = vld [vmem:[%s2149_s1 + $0x90] sm:$0xff] }
  0x23   : > { %1224 = vmatpush3.bf16.msra.mxu0 %v1223_v49  ;;  %1256 = vmatpush3.bf16.msra.mxu1 %v1253_v43  ;;  %v281_v31 = vld [vmem:[%s2149_s1 + $0x8] sm:$0xff]  ;;  %v379_v32 = vld [vmem:[%s1702_s29 + $0x60] sm:$0xf]  ;;  %v451_v36 = vrot.slane %v380_v24, 4  ;;  %v299_v38 = vld [vmem:[%s2149_s1 + $0x98] sm:$0xff]  ;;  %v442_v41 = vsel %vm439_vm0, %v440_v26, %v441_v27 }
  0x24   : > { %1226 = vmatprep.subr.bf16.mxu0 %v1225_v53  ;;  %1258 = vmatprep.subr.bf16.mxu1 %v1257_v59  ;;  %v312_v34 = vld [vmem:[%s2149_s1 + $0x100] sm:$0xff]  ;;  %v313_v35 = vld [vmem:[%s2149_s1 + $0x108] sm:$0xff]  ;;  %v330_v39 = vld [vmem:[%s2149_s1 + $0x190] sm:$0xff]  ;;  %v1271_v42 = vpack.c.bf16 %v281_v31, %v280_v30  ;;  %v449_v43 = vrot.slane %v379_v32, 4  ;;  %v454_v44 = vsel %vm439_vm0, %v447_v58, %v453_v28  ;;  %v1273_v51 = vpack.c.bf16 %v299_v38, %v298_v37 }
  0x25   : > { %v331_v40 = vld [vmem:[%s2149_s1 + $0x198] sm:$0xff]  ;;  %v1303_v45 = vpack.c.bf16 %v313_v35, %v312_v34  ;;  %v282_v46 = vld [vmem:[%s2149_s1 + $0x10] sm:$0xff]  ;;  %v452_v49 = vsel %vm439_vm0, %v444_v56, %v451_v36  ;;  %v300_v55 = vld [vmem:[%s2149_s1 + $0xa0] sm:$0xff] }
  0x26   : > { %v283_v47 = vld [vmem:[%s2149_s1 + $0x18] sm:$0xff]  ;;  %v314_v48 = vld [vmem:[%s2149_s1 + $0x110] sm:$0xff]  ;;  %v1305_v53 = vpack.c.bf16 %v331_v40, %v330_v39  ;;  %v301_v57 = vld [vmem:[%s2149_s1 + $0xa8] sm:$0xff] }
  0x27   : > { %1228 = vmatpush3.bf16.msra.mxu0 %v1227_v2  ;;  %1260 = vmatpush3.bf16.msra.mxu1 %v1257_v59  ;;  %v315_v54 = vld [vmem:[%s2149_s1 + $0x118] sm:$0xff]  ;;  %v332_v58 = vld [vmem:[%s2149_s1 + $0x1a0] sm:$0xff]  ;;  %v333_v56 = vld [vmem:[%s2149_s1 + $0x1a8] sm:$0xff]  ;;  %v450_v59 = vsel %vm439_vm0, %v441_v27, %v449_v43  ;;  %v1275_v60 = vpack.c.bf16 %v283_v47, %v282_v46  ;;  %v1277_v62 = vpack.c.bf16 %v301_v57, %v300_v55 }
  0x28   : > { %1230 = vmatprep.subr.bf16.mxu0 %v1229_v4  ;;  %1262 = vmatprep.subr.bf16.mxu1 %v1261_v7  ;;  %v1307_v61 = vpack.c.bf16 %v315_v54, %v314_v48  ;;  %v284_v63 = vld [vmem:[%s2149_s1 + $0x20] sm:$0xff]  ;;  %v285_v0 = vld [vmem:[%s2149_s1 + $0x28] sm:$0xff]  ;;  %v1309_v2 = vpack.c.bf16 %v333_v56, %v332_v58  ;;  %v302_v4 = vld [vmem:[%s2149_s1 + $0xb0] sm:$0xff] }
  0x29   : > { %v316_v1 = vld [vmem:[%s2149_s1 + $0x120] sm:$0xff]  ;;  %v317_v3 = vld [vmem:[%s2149_s1 + $0x128] sm:$0xff]  ;;  %v303_v5 = vld [vmem:[%s2149_s1 + $0xb8] sm:$0xff]  ;;  %v1279_v8 = vpack.c.bf16 %v285_v0, %v284_v63 }
  0x2a   : > { %v334_v6 = vld [vmem:[%s2149_s1 + $0x1b0] sm:$0xff]  ;;  %v287_v10 = vld [vmem:[%s2149_s1 + $0x38] sm:$0xff]  ;;  %v1311_v11 = vpack.c.bf16 %v317_v3, %v316_v1  ;;  %v304_v19 = vld [vmem:[%s2149_s1 + $0xc0] sm:$0xff] }
  0x2b   : > { %1232 = vmatpush3.bf16.msra.mxu0 %v1231_v12  ;;  %1264 = vmatpush3.bf16.msra.mxu1 %v1261_v7  ;;  %v335_v7 = vld [vmem:[%s2149_s1 + $0x1b8] sm:$0xff]  ;;  %v286_v9 = vld [vmem:[%s2149_s1 + $0x30] sm:$0xff]  ;;  %v1281_v12 = vpack.c.bf16 %v303_v5, %v302_v4  ;;  %v305_v20 = vld [vmem:[%s2149_s1 + $0xc8] sm:$0xff] }
  0x2c   : > { %1234 = vmatprep.subr.bf16.mxu0 %v1233_v14  ;;  %1266 = vmatprep.subr.bf16.mxu1 %v1265_v18  ;;  %v318_v13 = vld [vmem:[%s2149_s1 + $0x130] sm:$0xff]  ;;  %v269_v14 = vld [vmem:[%s1702_s29 + $0x8] sm:$0xff]  ;;  %v271_v15 = vld [vmem:[%s1702_s29 + $0x18] sm:$0xff]  ;;  %v1313_v17 = vpack.c.bf16 %v335_v7, %v334_v6  ;;  %v1283_v23 = vpack.c.bf16 %v287_v10, %v286_v9 }
  0x2d   : > { %v336_v21 = vld [vmem:[%s2149_s1 + $0x1c0] sm:$0xff]  ;;  %v337_v22 = vld [vmem:[%s2149_s1 + $0x1c8] sm:$0xff]  ;;  %v306_v31 = vld [vmem:[%s2149_s1 + $0xd0] sm:$0xff] }
  0x2e   : > { %v288_v26 = vld [vmem:[%s2149_s1 + $0x40] sm:$0xff]  ;;  %v289_v27 = vld [vmem:[%s2149_s1 + $0x48] sm:$0xff]  ;;  %v307_v32 = vld [vmem:[%s2149_s1 + $0xd8] sm:$0xff] }
  0x2f   : > { %1236 = vmatpush3.bf16.msra.mxu0 %v1235_v25  ;;  %1268 = vmatpush3.bf16.msra.mxu1 %v1265_v18  ;;  %v319_v18 = vld [vmem:[%s2149_s1 + $0x138] sm:$0xff]  ;;  %v1285_v25 = vpack.c.bf16 %v305_v20, %v304_v19  ;;  %v320_v28 = vld [vmem:[%s2149_s1 + $0x140] sm:$0xff]  ;;  %v321_v30 = vld [vmem:[%s2149_s1 + $0x148] sm:$0xff]  ;;  %v1287_v35 = vpack.c.bf16 %v289_v27, %v288_v26  ;;  %v1289_v37 = vpack.c.bf16 %v307_v32, %v306_v31 }
  0x30   : > { %1270 = vmatprep.subr.bf16.mxu0 %v1269_v29  ;;  %1302 = vmatprep.subr.bf16.mxu1 %v1301_v33  ;;  %v1315_v24 = vpack.c.bf16 %v319_v18, %v318_v13  ;;  %v1317_v29 = vpack.c.bf16 %v337_v22, %v336_v21  ;;  %v338_v33 = vld [vmem:[%s2149_s1 + $0x1d0] sm:$0xff]  ;;  %v339_v34 = vld [vmem:[%s2149_s1 + $0x1d8] sm:$0xff]  ;;  %v1319_v36 = vpack.c.bf16 %v321_v30, %v320_v28  ;;  %v308_v43 = vld [vmem:[%s2149_s1 + $0xe0] sm:$0xff] }
  0x31   : > { %v290_v38 = vld [vmem:[%s2149_s1 + $0x50] sm:$0xff]  ;;  %v291_v39 = vld [vmem:[%s2149_s1 + $0x58] sm:$0xff]  ;;  %v341_v46 = vld [vmem:[%s2149_s1 + $0x1e8] sm:$0xff] }
  0x32   : > { %526 = vmatmul.mubr.f32.vlgmr.msra.gmra.mrb[0].mxu0 %v442_v41  ;;  %1203 = vmatmul.mubr.f32.vlgmr.msra.gmra.mrb[0].mxu1 %v454_v44  ;;  %v322_v40 = vld [vmem:[%s2149_s1 + $0x150] sm:$0xff]  ;;  %v1321_v41 = vpack.c.bf16 %v339_v34, %v338_v33  ;;  %v309_v44 = vld [vmem:[%s2149_s1 + $0xe8] sm:$0xff]  ;;  %v1291_v47 = vpack.c.bf16 %v291_v39, %v290_v38  ;;  %v324_v54 = vld [vmem:[%s2149_s1 + $0x160] sm:$0xff] }
  0x33   : > { %1272 = vmatpush3.bf16.msra.mxu0 %v1271_v42  ;;  %1304 = vmatpush3.bf16.msra.mxu1 %v1303_v45  ;;  %v323_v42 = vld [vmem:[%s2149_s1 + $0x158] sm:$0xff]  ;;  %v340_v45 = vld [vmem:[%s2149_s1 + $0x1e0] sm:$0xff]  ;;  %v325_v57 = vld [vmem:[%s2149_s1 + $0x168] sm:$0xff] }
  0x34   : > { %530 = vmatprep.mubr.f32.mxu0 %v452_v49  ;;  %1274 = vmatprep.subr.bf16.mxu0 %v1273_v51  ;;  %v1323_v48 = vpack.c.bf16 %v323_v42, %v322_v40  ;;  %v1293_v49 = vpack.c.bf16 %v309_v44, %v308_v43  ;;  %v292_v51 = vld [vmem:[%s2149_s1 + $0x60] sm:$0xff]  ;;  %v1325_v55 = vpack.c.bf16 %v341_v46, %v340_v45  ;;  %v310_v58 = vld [vmem:[%s2149_s1 + $0xf0] sm:$0xff]  ;;  %v311_v56 = vld [vmem:[%s2149_s1 + $0xf8] sm:$0xff] }
  0x35   : > { %1306 = vmatprep.subr.bf16.mxu1 %v1305_v53  ;;  %750 = vmatprep.mubr.f32.mxu1 %v271_v15  ;;  %v293_v53 = vld [vmem:[%s2149_s1 + $0x68] sm:$0xff]  ;;  %v1297_v63 = vpack.c.bf16 %v311_v56, %v310_v58  ;;  %v294_v0 = vld [vmem:[%s2149_s1 + $0x70] sm:$0xff]  ;;  %v295_v1 = vld [vmem:[%s2149_s1 + $0x78] sm:$0xff] }
  0x36   : > { %531 = vmatmul.mubr.f32.gmra.mrb[2].mxu0 %v450_v59  ;;  %v342_v59 = vld [vmem:[%s2149_s1 + $0x1f0] sm:$0xff]  ;;  %v327_v4 = vld [vmem:[%s2149_s1 + $0x178] sm:$0xff]  ;;  %v360_v5 = vld [vmem:[%s2149_s1 + $0x280] sm:$0xff]  ;;  %v1299_v7 = vpack.c.bf16 %v295_v1, %v294_v0 }
  0x37   : > { %1276 = vmatpush3.bf16.msra.mxu0 %v1275_v60  ;;  %1308 = vmatpush3.bf16.msra.mxu1 %v1307_v61  ;;  %v343_v60 = vld [vmem:[%s2149_s1 + $0x1f8] sm:$0xff]  ;;  %v1295_v61 = vpack.c.bf16 %v293_v53, %v292_v51  ;;  %v361_v6 = vld [vmem:[%s2149_s1 + $0x288] sm:$0xff]  ;;  %v344_v10 = vld [vmem:[%s2149_s1 + $0x200] sm:$0xff] }
  0x38   : > { %1278 = vmatprep.subr.bf16.mxu0 %v1277_v62  ;;  %1310 = vmatprep.subr.bf16.mxu1 %v1309_v2  ;;  %v1327_v62 = vpack.c.bf16 %v325_v57, %v324_v54  ;;  %v326_v2 = vld [vmem:[%s2149_s1 + $0x170] sm:$0xff]  ;;  %v1329_v3 = vpack.c.bf16 %v343_v60, %v342_v59  ;;  %v1333_v9 = vpack.c.bf16 %v361_v6, %v360_v5  ;;  %v363_v13 = vld [vmem:[%s2149_s1 + $0x298] sm:$0xff]  ;;  %v364_v21 = vld [vmem:[%s2149_s1 + $0x2a0] sm:$0xff] }
  0x39   : > { %675 = vmatprep.mubr.f32.mxu0 %v269_v14  ;;  %v268_v14 = vld [vmem:[%s1702_s29] sm:$0xff]  ;;  %v346_v18 = vld [vmem:[%s2149_s1 + $0x210] sm:$0xff]  ;;  %v347_v19 = vld [vmem:[%s2149_s1 + $0x218] sm:$0xff] }
  0x3a   : > { %v365_v22 = vld [vmem:[%s2149_s1 + $0x2a8] sm:$0xff]  ;;  %v348_v26 = vld [vmem:[%s2149_s1 + $0x220] sm:$0xff]  ;;  %v366_v28 = vld [vmem:[%s2149_s1 + $0x2b0] sm:$0xff] }
  0x3b   : > { %1280 = vmatpush3.bf16.msra.mxu0 %v1279_v8  ;;  %1312 = vmatpush3.bf16.msra.mxu1 %v1311_v11  ;;  %v1331_v8 = vpack.c.bf16 %v327_v4, %v326_v2  ;;  %v345_v11 = vld [vmem:[%s2149_s1 + $0x208] sm:$0xff]  ;;  %v279_v31 = vld [vmem:[%s1702_s29 + $0x58] sm:$0xff]  ;;  %v350_v33 = vld [vmem:[%s2149_s1 + $0x230] sm:$0xff] }
  0x3c   : > { %1282 = vmatprep.subr.bf16.mxu0 %v1281_v12  ;;  %1314 = vmatprep.subr.bf16.mxu1 %v1313_v17  ;;  %v362_v12 = vld [vmem:[%s2149_s1 + $0x290] sm:$0xff]  ;;  %v1335_v15 = vpack.c.bf16 %v345_v11, %v344_v10  ;;  %v349_v27 = vld [vmem:[%s2149_s1 + $0x228] sm:$0xff]  ;;  %v351_v34 = vld [vmem:[%s2149_s1 + $0x238] sm:$0xff] }
  0x3d   : > { %v270_v17 = vld [vmem:[%s1702_s29 + $0x10] sm:$0xff]  ;;  %v1337_v20 = vpack.c.bf16 %v363_v13, %v362_v12  ;;  %v1343_v30 = vpack.c.bf16 %v349_v27, %v348_v26  ;;  %v353_v38 = vld [vmem:[%s2149_s1 + $0x248] sm:$0xff]  ;;  %v371_v40 = vld [vmem:[%s2149_s1 + $0x2d8] sm:$0xff] }
  0x3e   : > { %v370_v39 = vld [vmem:[%s2149_s1 + $0x2d0] sm:$0xff]  ;;  %v355_v44 = vld [vmem:[%s2149_s1 + $0x258] sm:$0xff]  ;;  %v372_v45 = vld [vmem:[%s2149_s1 + $0x2e0] sm:$0xff] }
  0x3f   : > { %1284 = vmatpush3.bf16.msra.mxu0 %v1283_v23  ;;  %1316 = vmatpush3.bf16.msra.mxu1 %v1315_v24  ;;  %v277_v23 = vld [vmem:[%s1702_s29 + $0x48] sm:$0xff]  ;;  %v1339_v24 = vpack.c.bf16 %v347_v19, %v346_v18  ;;  %v1353_v42 = vpack.c.bf16 %v371_v40, %v370_v39  ;;  %v354_v43 = vld [vmem:[%s2149_s1 + $0x250] sm:$0xff]  ;;  %v375_v54 = vld [vmem:[%s2149_s1 + $0x2f8] sm:$0xff] }
  0x40   : > { %1286 = vmatprep.subr.bf16.mxu0 %v1285_v25  ;;  %1318 = vmatprep.subr.bf16.mxu1 %v1317_v29  ;;  %v1341_v25 = vpack.c.bf16 %v365_v22, %v364_v21  ;;  %v367_v29 = vld [vmem:[%s2149_s1 + $0x2b8] sm:$0xff]  ;;  %v373_v46 = vld [vmem:[%s2149_s1 + $0x2e8] sm:$0xff]  ;;  %v374_v53 = vld [vmem:[%s2149_s1 + $0x2f0] sm:$0xff] }
  0x41   : > { %v1345_v32 = vpack.c.bf16 %v367_v29, %v366_v28  ;;  %v357_v51 = vld [vmem:[%s2149_s1 + $0x268] sm:$0xff]  ;;  %v1361_v57 = vpack.c.bf16 %v375_v54, %v374_v53  ;;  %v358_v58 = vld [vmem:[%s2149_s1 + $0x270] sm:$0xff]  ;;  %v359_v56 = vld [vmem:[%s2149_s1 + $0x278] sm:$0xff] }
  0x42   : > { %v1363_v59 = vpack.c.bf16 %v359_v56, %v358_v58  ;;  %v272_v60 = vld [vmem:[%s1702_s29 + $0x20] sm:$0xff] }
  0x43   : > { %1288 = vmatpush3.bf16.msra.mxu0 %v1287_v35  ;;  %1320 = vmatpush3.bf16.msra.mxu1 %v1319_v36  ;;  %v1347_v35 = vpack.c.bf16 %v351_v34, %v350_v33 }
  0x44   : > { %1290 = vmatprep.subr.bf16.mxu0 %v1289_v37  ;;  %1322 = vmatprep.subr.bf16.mxu1 %v1321_v41  ;;  %v352_v37 = vld [vmem:[%s2149_s1 + $0x240] sm:$0xff] }
  0x45   : > { %v1351_v41 = vpack.c.bf16 %v353_v38, %v352_v37 }
  0x47   : > { %1292 = vmatpush3.bf16.msra.mxu0 %v1291_v47  ;;  %1324 = vmatpush3.bf16.msra.mxu1 %v1323_v48  ;;  %v1355_v47 = vpack.c.bf16 %v355_v44, %v354_v43  ;;  %v1357_v48 = vpack.c.bf16 %v373_v46, %v372_v45 }
  0x48   : > { %1294 = vmatprep.subr.bf16.mxu0 %v1293_v49  ;;  %1326 = vmatprep.subr.bf16.mxu1 %v1325_v55  ;;  %v356_v49 = vld [vmem:[%s2149_s1 + $0x260] sm:$0xff] }
  0x49   : > { %v1359_v55 = vpack.c.bf16 %v357_v51, %v356_v49 }
  0x4b   : > { %1296 = vmatpush3.bf16.msra.mxu0 %v1295_v61  ;;  %1328 = vmatpush3.bf16.msra.mxu1 %v1327_v62  ;;  %v278_v61 = vld [vmem:[%s1702_s29 + $0x50] sm:$0xff] }
  0x4c   : > { %1298 = vmatprep.subr.bf16.mxu0 %v1297_v63  ;;  %1330 = vmatprep.subr.bf16.mxu1 %v1329_v3 }
  0x4f   : > { %1300 = vmatpush3.bf16.msra.mxu0 %v1299_v7  ;;  %1332 = vmatpush3.bf16.msra.mxu1 %v1331_v8 }
  0x50   : > { %1334 = vmatprep.subr.bf16.mxu0 %v1333_v9  ;;  %1365 = vmatprep.subr.bf16.mxu1 %v1333_v9 }
  0x52   : > { %676 = vmatmul.mubr.f32.vlgmr.msra.gmra.mrb[4].mxu0 %v268_v14  ;;  %751 = vmatmul.mubr.f32.vlgmr.msra.gmra.mrb[2].mxu1 %v270_v17 }
  0x53   : > { %1336 = vmatpush3.bf16.msra.mxu0 %v1335_v15  ;;  %1373 = vmatpush3.bf16.msra.mxu1 %v1335_v15 }
  0x54   : > { %680 = vmatprep.mubr.f32.mxu0 %v1720_v50  ;;  %1338 = vmatprep.subr.bf16.mxu0 %v1337_v20  ;;  %v273_v50 = vld [vmem:[%s1702_s29 + $0x28] sm:$0xff]  ;;  %s248_s29 = sand.u32 1, %s1501_s16  }
  0x55   : > { %1366 = vmatprep.subr.bf16.mxu1 %v1337_v20  ;;  %755 = vmatprep.mubr.f32.mxu1 %v277_v23  ;;  %s991_s9 = sshll.u32 %s248_s29, 4  ;;  %s2102_s22 = scalar_lea.sflag [#allocation3], %s248_s29 }
  0x56   : > { %681 = vmatmul.mubr.f32.gmra.mrb[6].mxu0 %v1775_v16  ;;  %756 = vmatmul.mubr.f32.gmra.mrb[4].mxu1 %v1724_v52  ;;  %v368_v16 = vld [vmem:[%s2149_s1 + $0x2c0] sm:$0xff]  ;;  %v369_v52 = vld [vmem:[%s2149_s1 + $0x2c8] sm:$0xff]  ;;  %s250_s30 = scalar_lea.vmem [#allocation2], %s991_s9 }
  0x57   : > { %1340 = vmatpush3.bf16.msra.mxu0 %v1339_v24  ;;  %1374 = vmatpush3.bf16.msra.mxu1 %v1339_v24  ;;  %v1349_v36 = vpack.c.bf16 %v369_v52, %v368_v16  ;;  %s864_s12 = sshll.u32 %s250_s30, 4  ;;  %s2095_s12 = int_to_ptr.vmem [resolvable:$true] %s864_s12 }
  0x58   : > { %1342 = vmatprep.subr.bf16.mxu0 %v1341_v25  ;;  %1367 = vmatprep.subr.bf16.mxu1 %v1341_v25  ;;  %s1439_s24 = scalar_lea.vmem %s2095_s12, 256  ;;  %p1446_p1 = scmp.lt.s32.totalorder %s2095_s12, %s1444_s26 }
  0x59   : > { %825 = vmatprep.mubr.f32.mxu0 %v273_v50  ;;  %830 = vmatprep.mubr.f32.mxu1 %v279_v31  ;;  %v993_v50 = vld [vmem:[%s2151_s3] ss:$0 sm:$0xff]  ;;  %p1440_p12 = scmp.ne.s32.totalorder %s2095_s12, %s1439_s24  ;;  %p1447_p2 = scmp.lt.s32.totalorder %s1445_s5, %s1439_s24 }
  0x5b   : > { %1344 = vmatpush3.bf16.msra.mxu0 %v1343_v30  ;;  %1375 = vmatpush3.bf16.msra.mxu1 %v1343_v30  ;;  %p1441_p13 = pnand %p1440_p12, %p1587_p4  ;;  %p1448_p3 = por %p1447_p2, %p1446_p1 }
  0x5c   : > { %1346 = vmatprep.subr.bf16.mxu0 %v1345_v32  ;;  %1368 = vmatprep.subr.bf16.mxu1 %v1345_v32 }
  0x5d   : > { %p1442_p0 = pneg %p1441_p13 }
  0x5f   : > { %1348 = vmatpush3.bf16.msra.mxu0 %v1347_v35  ;;  %1376 = vmatpush3.bf16.msra.mxu1 %v1347_v35  ;;  %p1449_p5 = pnand %p1448_p3, %p1442_p0 }
  0x60   : > { %1350 = vmatprep.subr.bf16.mxu0 %v1349_v36  ;;  %1369 = vmatprep.subr.bf16.mxu1 %v1349_v36 }
  0x63   : > { %1352 = vmatpush3.bf16.msra.mxu0 %v1351_v41  ;;  %1377 = vmatpush3.bf16.msra.mxu1 %v1351_v41 }
  0x64   : > { %1354 = vmatprep.subr.bf16.mxu0 %v1353_v42  ;;  %1370 = vmatprep.subr.bf16.mxu1 %v1353_v42 }
  0x67   : > { %1356 = vmatpush3.bf16.msra.mxu0 %v1355_v47  ;;  %1378 = vmatpush3.bf16.msra.mxu1 %v1355_v47 }
  0x68   : > { %1358 = vmatprep.subr.bf16.mxu0 %v1357_v48  ;;  %1371 = vmatprep.subr.bf16.mxu1 %v1357_v48 }
  0x6b   : > { %1360 = vmatpush3.bf16.msra.mxu0 %v1359_v55  ;;  %1379 = vmatpush3.bf16.msra.mxu1 %v1359_v55 }
  0x6c   : > { %1362 = vmatprep.subr.bf16.mxu0 %v1361_v57  ;;  %1372 = vmatprep.subr.bf16.mxu1 %v1361_v57 }
  0x6f   : > { %1364 = vmatpush3.bf16.msra.mxu0 %v1363_v59  ;;  %1380 = vmatpush3.bf16.msra.mxu1 %v1363_v59 }
  0x72   : > { %826 = vmatmul.mubr.f32.vlgmr.msra.gmra.mrb[8].mxu0 %v272_v60  ;;  %831 = vmatmul.mubr.f32.vlgmr.msra.gmra.mrb[6].mxu1 %v278_v61 }
 0x105   : > { %v1032_v62 = vpop.f32.mrb[0].mxu0  ;;  %v1204_v63 = vpop.f32.mrb[0].mxu1 }
 0x106   : > { %v1033_v0 = vpop.f32.mrb[1].mxu0  ;;  %v602_v2 = vpop.f32.mrb[1].mxu1 }
 0x107   : > { %v1034_v1 = vadd.f32 %v1033_v0, %v1032_v62 }
 0x109   : > { %v603_v3 = vadd.f32 %v1034_v1, %v602_v2  ;;  %v1035_v4 = vpop.f32.mrb[2].mxu0 }
 0x10a   : > { %v1036_v5 = vpop.f32.mrb[3].mxu0 }
 0x10b   : > { %v1037_v6 = vadd.f32 %v1036_v5, %v1035_v4 }
 0x10d   : > { %v608_v7 = vadd.f32 %v1204_v63, %v1037_v6 }
 0x125   : > { %v1088_v8 = vpop.f32.mrb[4].mxu0  ;;  %v1126_v9 = vpop.f32.mrb[2].mxu1 }
 0x126   : > { %v1089_v10 = vpop.f32.mrb[5].mxu0  ;;  %v1127_v12 = vpop.f32.mrb[3].mxu1 }
 0x127   : > { %v1090_v11 = vadd.f32 %v1089_v10, %v1088_v8  ;;  %v1128_v13 = vadd.f32 %v1127_v12, %v1126_v9 }
 0x129   : > { %v678_v14 = vadd.f32 %v1090_v11, %v603_v3  ;;  %v1091_v15 = vpop.f32.mrb[6].mxu0  ;;  %v1129_v18 = vpop.f32.mrb[4].mxu1 }
 0x12a   : > { %v1092_v17 = vpop.f32.mrb[7].mxu0  ;;  %v1130_v21 = vpop.f32.mrb[5].mxu1 }
 0x12b   : > { %v753_v19 = vadd.f32 %v1128_v13, %v678_v14  ;;  %v1093_v20 = vadd.f32 %v1092_v17, %v1091_v15  ;;  %v1131_v22 = vadd.f32 %v1130_v21, %v1129_v18 }
 0x12d   : > { %v683_v23 = vadd.f32 %v1093_v20, %v608_v7 }
 0x12f   : > { %v758_v24 = vadd.f32 %v1131_v22, %v683_v23 }
 0x145   : > { %v1164_v25 = vpop.f32.mrb[8].mxu0  ;;  %v1167_v26 = vpop.f32.mrb[6].mxu1 }
 0x146   : > { %v1165_v27 = vpop.f32.mrb[9].mxu0  ;;  %v1168_v29 = vpop.f32.mrb[7].mxu1 }
 0x147   : > { %v1166_v28 = vadd.f32 %v1165_v27, %v1164_v25  ;;  %v1169_v30 = vadd.f32 %v1168_v29, %v1167_v26 }
 0x149   : > { %v828_v31 = vadd.f32 %v1166_v28, %v753_v19  ;;  %v833_v32 = vadd.f32 %v1169_v30, %v758_v24 }
 0x14b   : > { %v843_v33 = vadd.f32 %v993_v50, %v828_v31  ;;  %v844_v34 = vadd.f32 %v993_v50, %v833_v32 }
 0x14d   : > { %845 = vst [vmem:[%s250_s30] sm:$0xff] %v843_v33  ;;  %846 = vst [vmem:[%s250_s30 + $0x8] sm:$0xff] %v844_v34 }
 0x14e   : > { %1452 = shalt.err (!%p1449_p5)
}
 0x14f   : > { %s1453_s6 = scalar_lea.hbm %s2100_s21, 256  ;;  %s1457_s9 = scalar_lea.hbm %s2152_s4, 512 }
 0x150   : > { %p1454_p6 = scmp.ne.s32.totalorder %s2100_s21, %s1453_s6  ;;  %p1458_p10 = scmp.lt.u32.totalorder %s2100_s21, %s2152_s4 }
 0x151   : > { %p1459_p11 = scmp.lt.u32.totalorder %s1457_s9, %s1453_s6  ;;  %p1461_p13 = scmp.lt.u32.totalorder %s1453_s6, %s2100_s21 }
 0x152   : > { %p1455_p7 = pnand %p1454_p6, %p1587_p4 }
 0x153   : > { %p1460_p12 = por %p1459_p11, %p1458_p10 }
 0x154   : > { %p1456_p9 = pneg %p1455_p7 }
 0x155   : > { %p1462_p0 = por %p1461_p13, %p1460_p12 }
 0x157   : > { %p1463_p1 = pnand %p1462_p0, %p1456_p9 }
 0x159   : > { %1466 = shalt.err (!%p1463_p1)
}
 0x15a   : > { %s1520_s30 = smov 128   ;;  %s1521_s13 = smov 8  }
 0x15b   : > { %1382 = dma.vmem_to_hbm [thread:$0]  (%p1587_p4), %s2095_s12, 256, %s2100_s21, %s2102_s22, %s1520_s30, %s1520_s30, %s1521_s13  }
 0x15c PF: > { %p1388_p2 = scmp.ge.s32.totalorder %s1517_s20, 2  ;;  %s879_s7 = sand.u32 1, %s1497_s15  }
 0x15d   : > { %s880_s14 = scalar_lea.sflag [#allocation3], %s879_s7 }
 0x15e   : > { %p1385_p3 = pnand %p1388_p2, %p1594_p8 }
 0x160   : > { %1492 = dma.done.wait (!%p1385_p3), %s880_s14, 256  }
 0x161   : > { %1494 = vsyncadd (!%p1385_p3), %s880_s14, 4294967040  ;;  %s17_s20 = sadd.s32 1, %s1517_s20   ;;  %s2155_s15 = smov %s1501_s16 }
 0x162   : > { %p14_p5 = scmp.ge.s32.totalorder %s17_s20, 4   ;;  %s2156_s16 = smov %s1505_s17 }
 0x163   : > { %s2157_s17 = smov %s1600_s28  ;;  %s2158_s18 = smov %s1513_s19 }
 0x164   : > { %s2159_s19 = smov %s2161_s23  ;;  %16 = sbr.rel (!%p14_p5) target bundleno = 4 (0x4), region = 80 }
 0x16b   :  { %885 = vsyncpa [#allocation3], 1 }
 0x16c   :  { %887 = vsyncpa [#allocation3 + $0x1], 1 }

</bundles_post_ra>
